<compile_context>
chip_gen: v7x
topology: tpu7x:2x2x1
jax: 0.10.0
libtpu: 0.0.40
codegen_flags: <defaults>
</compile_context>

<pallas_src>
import jax
import jax.numpy as jnp
from jax.experimental import pallas as pl
from jax.experimental.pallas import tpu as pltpu


def _round_up(x, m):
    return ((x + m - 1) // m) * m


def relation_classifier_kernel(h_ref, t_ref, w1h_ref, w1t_ref, b1_ref,
                               w2_ref, b2_ref, o_ref):
    # h_ref/t_ref : (TB, D)   bf16
    # w1h/w1t     : (D, H)    bf16, b1: (1, H) f32
    # w2          : (H, C)    bf16, b2: (1, C) f32
    # o_ref       : (TB, C)   f32 softmax probabilities

    # fc1: split-weight matmul replaces the torch.cat; both bf16 dots
    # accumulate in f32 on the MXU.
    h = jnp.dot(h_ref[...], w1h_ref[...], preferred_element_type=jnp.float32)
    h = h + jnp.dot(t_ref[...], w1t_ref[...], preferred_element_type=jnp.float32)
    h = jnp.maximum(h + b1_ref[...], 0.0)

    # fc2: cast the ReLU output to bf16 for the MXU, accumulate in f32.
    logits = jnp.dot(h.astype(w2_ref.dtype), w2_ref[...],
                     preferred_element_type=jnp.float32) + b2_ref[...]

    # Numerically stable softmax over the real classes, all in f32.
    m = jnp.max(logits, axis=1, keepdims=True)
    e = jnp.exp(logits - m)
    denom = jnp.sum(e, axis=1, keepdims=True)
    inv = pl.reciprocal(denom, approx=True)   # EUP slot; VALU stays free
    o_ref[...] = (e * inv).astype(o_ref.dtype)


def relation_classifier(h_vec, t_vec, w1, b1, w2, b2, *, batch_tile=512):
    """Forward pass matching the PyTorch RelationClassifier."""
    B, D = h_vec.shape
    in_size, hidden = w1.shape
    num_classes = w2.shape[1]
    assert in_size == 2 * D, "w1 must have in_features == 2 * feat"

    # bf16 operands for the MXU / input DMA; biases stay f32.
    h_bf = h_vec.astype(jnp.bfloat16)
    t_bf = t_vec.astype(jnp.bfloat16)
    w1_h = w1[:D, :].astype(jnp.bfloat16)
    w1_t = w1[D:, :].astype(jnp.bfloat16)
    w2_bf = w2.astype(jnp.bfloat16)
    b1_r = b1.reshape(1, hidden).astype(jnp.float32)
    b2_r = b2.reshape(1, num_classes).astype(jnp.float32)

    # Batch tile: as large as requested, never a lot bigger than B, and always
    # a multiple of 16 (bf16 sublane packing / (8,128) constraint).
    TB = min(batch_tile, _round_up(max(B, 1), 16))
    TB = _round_up(TB, 16)
    num_tiles = pl.cdiv(B, TB)   # ragged tail handled by Pallas block clipping

    # Advisory cost on the *real* (unpadded) work.
    cost = pl.CostEstimate(
        flops=2 * B * (2 * D * hidden + hidden * num_classes),
        transcendentals=B * (num_classes + 1),          # exp per logit + 1/denom
        bytes_accessed=(2 * (2 * B * D)                 # bf16 activations
                        + 2 * (2 * D * hidden + hidden * num_classes)  # bf16 weights
                        + 4 * (hidden + num_classes)    # f32 biases
                        + 4 * B * num_classes),         # f32 output
    )

    out = pl.pallas_call(
        relation_classifier_kernel,
        out_shape=jax.ShapeDtypeStruct((B, num_classes), jnp.float32),
        grid=(num_tiles,),
        in_specs=[
            pl.BlockSpec((TB, D), lambda i: (i, 0)),               # h_vec tile
            pl.BlockSpec((TB, D), lambda i: (i, 0)),               # t_vec tile
            pl.BlockSpec((D, hidden), lambda i: (0, 0)),           # w1_h (resident)
            pl.BlockSpec((D, hidden), lambda i: (0, 0)),           # w1_t (resident)
            pl.BlockSpec((1, hidden), lambda i: (0, 0)),           # b1   (resident)
            pl.BlockSpec((hidden, num_classes), lambda i: (0, 0)), # w2   (resident)
            pl.BlockSpec((1, num_classes), lambda i: (0, 0)),      # b2   (resident)
        ],
        out_specs=pl.BlockSpec((TB, num_classes), lambda i: (i, 0)),
        compiler_params=pltpu.CompilerParams(
            dimension_semantics=("parallel",)),   # batch axis; on v7x consider CORE_PARALLEL
        cost_estimate=cost,
    )(h_bf, t_bf, w1_h, w1_t, b1_r, w2_bf, b2_r)

    return out


if __name__ == "__main__":
    # Small shapes consistent with the module:
    #   h_vec, t_vec: (batch, feat) -> concat gives input_size = 2 * feat
    batch = 64
    feat = 16
    input_size = 2 * feat      # 32
    hidden_size = 32
    num_classes = 8

    key = jax.random.PRNGKey(0)
    k_h, k_t, k_w1, k_b1, k_w2, k_b2 = jax.random.split(key, 6)

    h_vec = jax.random.normal(k_h, (batch, feat), dtype=jnp.float32)
    t_vec = jax.random.normal(k_t, (batch, feat), dtype=jnp.float32)

    # Deterministic synthetic parameters (stored as (in, out) for x @ W + b).
    w1 = 0.1 * jax.random.normal(k_w1, (input_size, hidden_size), dtype=jnp.float32)
    b1 = 0.1 * jax.random.normal(k_b1, (hidden_size,), dtype=jnp.float32)
    w2 = 0.1 * jax.random.normal(k_w2, (hidden_size, num_classes), dtype=jnp.float32)
    b2 = 0.1 * jax.random.normal(k_b2, (num_classes,), dtype=jnp.float32)

    out = relation_classifier(h_vec, t_vec, w1, b1, w2, b2)
    out = jax.block_until_ready(out)

    # Sanity check against plain-JAX f32 reference; tolerance covers the bf16
    # MXU operands and the EUP approximate reciprocal in the softmax tail.
    x = jnp.concatenate([h_vec, t_vec], axis=1)
    ref = jax.nn.softmax(jnp.maximum(x @ w1 + b1, 0.0) @ w2 + b2, axis=1)
    assert out.shape == (batch, num_classes)
    assert jnp.allclose(out, ref, atol=1e-2, rtol=1e-2)
    assert jnp.allclose(jnp.sum(out, axis=1), 1.0, atol=5e-3)

    print("KERNEL_OK")
</pallas_src>

<mosaic_0001>
module attributes {stable_mosaic.version = 11 : i64} {
  func.func @relation_classifier_kernel(%arg0: i32, %arg1: memref<64x16xbf16, #tpu.memory_space<vmem>>, %arg2: memref<64x16xbf16, #tpu.memory_space<vmem>>, %arg3: memref<16x32xbf16, #tpu.memory_space<vmem>>, %arg4: memref<16x32xbf16, #tpu.memory_space<vmem>>, %arg5: memref<1x32xf32, #tpu.memory_space<vmem>>, %arg6: memref<32x8xbf16, #tpu.memory_space<vmem>>, %arg7: memref<1x8xf32, #tpu.memory_space<vmem>>, %arg8: memref<64x8xf32, #tpu.memory_space<vmem>>) attributes {dimension_semantics = [#tpu.dimension_semantics<parallel>], iteration_bounds = array<i64: 1>, scalar_prefetch = 0 : i64, scratch_operands = 0 : i64, tpu.core_type = #tpu.core_type<tc>, window_params = [{transform_indices = @transform_0, window_bounds = array<i64: 64, 16>}, {transform_indices = @transform_1, window_bounds = array<i64: 64, 16>}, {pipeline_mode = #tpu.pipeline_mode<synchronous>, transform_indices = @transform_2, window_bounds = array<i64: 16, 32>}, {pipeline_mode = #tpu.pipeline_mode<synchronous>, transform_indices = @transform_3, window_bounds = array<i64: 16, 32>}, {pipeline_mode = #tpu.pipeline_mode<synchronous>, transform_indices = @transform_4, window_bounds = array<i64: 1, 32>}, {pipeline_mode = #tpu.pipeline_mode<synchronous>, transform_indices = @transform_5, window_bounds = array<i64: 32, 8>}, {pipeline_mode = #tpu.pipeline_mode<synchronous>, transform_indices = @transform_6, window_bounds = array<i64: 1, 8>}, {transform_indices = @transform_7, window_bounds = array<i64: 64, 8>}]} {
    %c0 = arith.constant 0 : index
    %c0_0 = arith.constant 0 : index
    %0 = vector.load %arg1[%c0, %c0_0] : memref<64x16xbf16, #tpu.memory_space<vmem>>, vector<64x16xbf16>
    %c0_1 = arith.constant 0 : index
    %c0_2 = arith.constant 0 : index
    %1 = vector.load %arg3[%c0_1, %c0_2] : memref<16x32xbf16, #tpu.memory_space<vmem>>, vector<16x32xbf16>
    %cst = arith.constant dense<0.000000e+00> : vector<64x32xf32>
    %2 = tpu.matmul %0, %1, %cst {dimension_numbers = #tpu.dot_dimension_numbers<[1], [0], [0], [1], [0, 0, 1, 1], [], []>} : vector<64x16xbf16>, vector<16x32xbf16>, vector<64x32xf32> -> vector<64x32xf32>
    %c0_3 = arith.constant 0 : index
    %c0_4 = arith.constant 0 : index
    %3 = vector.load %arg2[%c0_3, %c0_4] : memref<64x16xbf16, #tpu.memory_space<vmem>>, vector<64x16xbf16>
    %c0_5 = arith.constant 0 : index
    %c0_6 = arith.constant 0 : index
    %4 = vector.load %arg4[%c0_5, %c0_6] : memref<16x32xbf16, #tpu.memory_space<vmem>>, vector<16x32xbf16>
    %cst_7 = arith.constant dense<0.000000e+00> : vector<64x32xf32>
    %5 = tpu.matmul %3, %4, %cst_7 {dimension_numbers = #tpu.dot_dimension_numbers<[1], [0], [0], [1], [0, 0, 1, 1], [], []>} : vector<64x16xbf16>, vector<16x32xbf16>, vector<64x32xf32> -> vector<64x32xf32>
    %6 = arith.addf %2, %5 : vector<64x32xf32>
    %c0_8 = arith.constant 0 : index
    %c0_9 = arith.constant 0 : index
    %7 = vector.load %arg5[%c0_8, %c0_9] : memref<1x32xf32, #tpu.memory_space<vmem>>, vector<1x32xf32>
    %8 = vector.broadcast %7 : vector<1x32xf32> to vector<64x32xf32>
    %9 = arith.addf %6, %8 : vector<64x32xf32>
    %cst_10 = arith.constant 0.000000e+00 : f32
    %10 = vector.broadcast %cst_10 : f32 to vector<64x32xf32>
    %11 = arith.maximumf %9, %10 : vector<64x32xf32>
    %12 = arith.truncf %11 : vector<64x32xf32> to vector<64x32xbf16>
    %c0_11 = arith.constant 0 : index
    %c0_12 = arith.constant 0 : index
    %13 = vector.load %arg6[%c0_11, %c0_12] : memref<32x8xbf16, #tpu.memory_space<vmem>>, vector<32x8xbf16>
    %cst_13 = arith.constant dense<0.000000e+00> : vector<64x8xf32>
    %14 = tpu.matmul %12, %13, %cst_13 {dimension_numbers = #tpu.dot_dimension_numbers<[1], [0], [0], [1], [0, 0, 1, 1], [], []>} : vector<64x32xbf16>, vector<32x8xbf16>, vector<64x8xf32> -> vector<64x8xf32>
    %c0_14 = arith.constant 0 : index
    %c0_15 = arith.constant 0 : index
    %15 = vector.load %arg7[%c0_14, %c0_15] : memref<1x8xf32, #tpu.memory_space<vmem>>, vector<1x8xf32>
    %16 = vector.broadcast %15 : vector<1x8xf32> to vector<64x8xf32>
    %17 = arith.addf %14, %16 : vector<64x8xf32>
    %cst_16 = arith.constant dense<0xFF800000> : vector<64xf32>
    %18 = vector.multi_reduction <maximumf>, %17, %cst_16 [1] : vector<64x8xf32> to vector<64xf32>
    %19 = vector.shape_cast %18 : vector<64xf32> to vector<64x1xf32>
    %20 = vector.broadcast %19 : vector<64x1xf32> to vector<64x8xf32>
    %21 = arith.subf %17, %20 : vector<64x8xf32>
    %22 = math.exp %21 : vector<64x8xf32>
    %cst_17 = arith.constant dense<0.000000e+00> : vector<64xf32>
    %23 = vector.multi_reduction <add>, %22, %cst_17 [1] : vector<64x8xf32> to vector<64xf32>
    %24 = vector.shape_cast %23 : vector<64xf32> to vector<64x1xf32>
    %25 = tpu.reciprocal %24 {approx = true} : vector<64x1xf32> -> vector<64x1xf32>
    %26 = vector.broadcast %25 : vector<64x1xf32> to vector<64x8xf32>
    %27 = arith.mulf %22, %26 : vector<64x8xf32>
    %c0_18 = arith.constant 0 : index
    %c0_19 = arith.constant 0 : index
    %28 = vector.load %arg8[%c0_18, %c0_19] : memref<64x8xf32, #tpu.memory_space<vmem>>, vector<64x8xf32>
    tpu.vector_store %arg8[%c0_18, %c0_19], %27 {strides = array<i32>} : memref<64x8xf32, #tpu.memory_space<vmem>>, vector<64x8xf32>,
    return
  }
  func.func @transform_0(%arg0: i32) -> (i32, i32) {
    %c0_i32 = arith.constant 0 : i32
    %c0_i32_0 = arith.constant 0 : i32
    return %arg0, %c0_i32 : i32, i32
  }
  func.func @transform_1(%arg0: i32) -> (i32, i32) {
    %c0_i32 = arith.constant 0 : i32
    %c0_i32_0 = arith.constant 0 : i32
    return %arg0, %c0_i32 : i32, i32
  }
  func.func @transform_2(%arg0: i32) -> (i32, i32) {
    %c0_i32 = arith.constant 0 : i32
    %c0_i32_0 = arith.constant 0 : i32
    %c0_i32_1 = arith.constant 0 : i32
    return %c0_i32, %c0_i32_0 : i32, i32
  }
  func.func @transform_3(%arg0: i32) -> (i32, i32) {
    %c0_i32 = arith.constant 0 : i32
    %c0_i32_0 = arith.constant 0 : i32
    %c0_i32_1 = arith.constant 0 : i32
    return %c0_i32, %c0_i32_0 : i32, i32
  }
  func.func @transform_4(%arg0: i32) -> (i32, i32) {
    %c0_i32 = arith.constant 0 : i32
    %c0_i32_0 = arith.constant 0 : i32
    %c0_i32_1 = arith.constant 0 : i32
    return %c0_i32, %c0_i32_0 : i32, i32
  }
  func.func @transform_5(%arg0: i32) -> (i32, i32) {
    %c0_i32 = arith.constant 0 : i32
    %c0_i32_0 = arith.constant 0 : i32
    %c0_i32_1 = arith.constant 0 : i32
    return %c0_i32, %c0_i32_0 : i32, i32
  }
  func.func @transform_6(%arg0: i32) -> (i32, i32) {
    %c0_i32 = arith.constant 0 : i32
    %c0_i32_0 = arith.constant 0 : i32
    %c0_i32_1 = arith.constant 0 : i32
    return %c0_i32, %c0_i32_0 : i32, i32
  }
  func.func @transform_7(%arg0: i32) -> (i32, i32) {
    %c0_i32 = arith.constant 0 : i32
    %c0_i32_0 = arith.constant 0 : i32
    return %arg0, %c0_i32 : i32, i32
  }
}

</mosaic_0001>

<bundles_post_ra>
// kernel: tpu_custom_call.1
= control target key start
LH: loop header
LB: loop body
LE: loop exit
PB: predicated region body
PF: predicated region fallthrough
CT: control target
= control target key end

     0   :  { %vm73_vm0 = vcmask 130048   ;;  %vm304_vm1 = vcmask 261120   ;;  %vm382_vm2 = vcmask 64512   ;;  %s753_s3 = inlined_call_operand.vmem [shape: bf16[16,32], index: 3, kind: input, shape index: {}]   ;;  %s754_s1 = inlined_call_operand.vmem [shape: bf16[64,16], index: 1, kind: input, shape index: {}]   ;;  %s755_s2 = inlined_call_operand.vmem [shape: bf16[16,32], index: 2, kind: input, shape index: {}]   ;;  %s756_s0 = inlined_call_operand.vmem [shape: bf16[64,16], index: 0, kind: input, shape index: {}]   ;;  %s757_s5 = inlined_call_operand.vmem [shape: bf16[32,8], index: 5, kind: input, shape index: {}]   ;;  %s758_s4 = inlined_call_operand.vmem [shape: f32[1,32], index: 4, kind: input, shape index: {}]   ;;  %s759_s6 = inlined_call_operand.vmem [shape: f32[1,8], index: 6, kind: input, shape index: {}]   ;;  %s760_s7 = inlined_call_operand.vmem [shape: f32[64,8], index: 7, kind: output, shape index: {}]  }
   0x1   :  { %v567_v0 = vld [vmem:[%s753_s3] sm:$0xff]   ;;  %v569_v2 = vld [vmem:[%s754_s1 + $0x8] sm:$0xff]   ;;  %v573_v5 = vld [vmem:[%s754_s1 + $0x10] sm:$0xff]  }
   0x2   :  { %v568_v1 = vld [vmem:[%s754_s1] sm:$0xff]   ;;  %525 = vmatprep.subr.bf16.mxu0 %v567_v0  ;;  %557 = vmatprep.subr.bf16.mxu1 %v567_v0  ;;  %v574_v6 = vld [vmem:[%s754_s1 + $0x18] sm:$0xff]   ;;  %v572_v7 = vld [vmem:[%s756_s0 + $0x8] sm:$0xff]  }
   0x3   :  { %526 = vmatpush3.bf16.msra.mxu0 %v567_v0  ;;  %527 = vmatprep.mubr.msk.bf16.mxu0 %vm73_vm0, %v568_v1  ;;  %v570_v3 = vld [vmem:[%s755_s2] sm:$0xff]   ;;  %v575_v8 = vld [vmem:[%s756_s0 + $0x10] sm:$0xff]   ;;  %v576_v9 = vld [vmem:[%s756_s0 + $0x18] sm:$0xff]  }
   0x4   :  { %v571_v4 = vld [vmem:[%s756_s0] sm:$0xff]   ;;  %558 = vmatpush3.bf16.msra.mxu1 %v567_v0  ;;  %535 = vmatprep.subr.bf16.mxu0 %v570_v3  ;;  %v578_v11 = vld [vmem:[%s757_s5 + $0x8] sm:$0xff]  }
   0x5   :  { %531 = vmatprep.mubr.msk.bf16.mxu1 %vm73_vm0, %v573_v5  ;;  %v577_v10 = vld [vmem:[%s757_s5] sm:$0xff]  }
   0x6   :  { %528 = vmatmul.mubr.msk.bf16.vlgmr.msra.gmra.mrb[0].mxu0 %vm73_vm0, %v569_v2  ;;  %545 = vmatprep.subr.bf16.mxu1 %v577_v10  ;;  %v501_v16 = vld [vmem:[%s758_s4] ss:$0 sm:$0xff] }
   0x7   :  { %536 = vmatpush3.bf16.msra.mxu0 %v570_v3  ;;  %537 = vmatprep.mubr.msk.bf16.mxu0 %vm73_vm0, %v571_v4  ;;  %v502_v49 = vld [vmem:[%s759_s6] ss:$0 sm:$0xff] }
   0x8   :  { %532 = vmatmul.mubr.msk.bf16.vlgmr.msra.gmra.mrb[0].mxu1 %vm73_vm0, %v574_v6 }
   0x9   :  { %546 = vmatpush3.bf16.msra.mxu1 %v577_v10 }
   0xa   :  { %547 = vmatprep.subr.bf16.mxu1 %v578_v11 }
   0xd   :  { %548 = vmatpush3.bf16.msra.mxu1 %v578_v11 }
  0x12   :  { %538 = vmatmul.mubr.msk.bf16.vlgmr.msra.gmra.mrb[0].mxu0 %vm73_vm0, %v572_v7 }
  0x13   :  { %541 = vmatprep.mubr.msk.bf16.mxu0 %vm73_vm0, %v575_v8 }
  0x1a   :  { %542 = vmatmul.mubr.msk.bf16.gmra.mrb[4].mxu0 %vm73_vm0, %v576_v9 }
  0xdb   :  { %v533_v12 = vpop.f32.mrb[0].mxu1 }
  0xdc   :  { %v136_v13 = vpop.f32.mrb[1].mxu1 }
  0xdd   :  { %v534_v14 = vpop.f32.mrb[2].mxu1 }
  0xde   :  { %v139_v15 = vpop.f32.mrb[3].mxu1 }
  0xe5   :  { %v539_v17 = vpop.f32.mrb[0].mxu0 }
  0xe6   :  { %v263_v18 = vadd.f32 %v539_v17, %v501_v16  ;;  %v223_v19 = vpop.f32.mrb[1].mxu0 }
  0xe7   :  { %v261_v20 = vadd.f32 %v501_v16, %v223_v19  ;;  %v540_v21 = vpop.f32.mrb[2].mxu0 }
  0xe8   :  { %v264_v22 = vadd.f32 %v540_v21, %v501_v16  ;;  %v226_v23 = vpop.f32.mrb[3].mxu0  ;;  %v271_v25 = vmax.f32 %v263_v18, 0.0 }
  0xe9   :  { %v262_v24 = vadd.f32 %v501_v16, %v226_v23  ;;  %v269_v27 = vmax.f32 %v261_v20, 0.0 }
  0xea   :  { %v272_v26 = vmax.f32 %v264_v22, 0.0 }
  0xeb   :  { %v270_v28 = vmax.f32 %v262_v24, 0.0 }
  0xec   :  { %v278_v29 = vpack.c.bf16 %v272_v26, %v271_v25 }
  0xed   :  { %v277_v30 = vpack.c.bf16 %v270_v28, %v269_v27  ;;  %v543_v31 = vpop.f32.mrb[4].mxu0 }
  0xee   :  { %v248_v32 = vadd.f32 %v543_v31, %v533_v12  ;;  %v239_v33 = vpop.f32.mrb[5].mxu0 }
  0xef   :  { %v240_v34 = vadd.f32 %v239_v33, %v136_v13  ;;  %v544_v35 = vpop.f32.mrb[6].mxu0  ;;  %549 = vmatprep.mubr.msk.bf16.mxu1 %vm304_vm1, %v277_v30 }
  0xf0   :  { %v267_v36 = vadd.f32 %v501_v16, %v248_v32  ;;  %v251_v37 = vadd.f32 %v544_v35, %v534_v14  ;;  %v242_v38 = vpop.f32.mrb[7].mxu0  ;;  %550 = vmatmul.mubr.msk.bf16.vlgmr.msra.gmra.mrb[4].mxu1 %vm304_vm1, %v278_v29 }
  0xf1   :  { %v265_v39 = vadd.f32 %v501_v16, %v240_v34  ;;  %v243_v40 = vadd.f32 %v242_v38, %v139_v15 }
  0xf2   :  { %v268_v41 = vadd.f32 %v501_v16, %v251_v37  ;;  %v275_v43 = vmax.f32 %v267_v36, 0.0 }
  0xf3   :  { %v266_v42 = vadd.f32 %v501_v16, %v243_v40  ;;  %v273_v45 = vmax.f32 %v265_v39, 0.0 }
  0xf4   :  { %v276_v44 = vmax.f32 %v268_v41, 0.0 }
  0xf5   :  { %v274_v46 = vmax.f32 %v266_v42, 0.0 }
  0xf6   :  { %v280_v47 = vpack.c.bf16 %v276_v44, %v275_v43 }
  0xf7   :  { %v279_v48 = vpack.c.bf16 %v274_v46, %v273_v45 }
  0xf9   :  { %553 = vmatprep.mubr.msk.bf16.mxu1 %vm304_vm1, %v279_v48 }
  0xfa   :  { %554 = vmatmul.mubr.msk.bf16.gmra.mrb[8].mxu1 %vm304_vm1, %v280_v47 }
 0x1c3   :  { %v551_v50 = vpop.f32.mrb[4].mxu1 }
 0x1c4   :  { %v360_v51 = vadd.f32 %v551_v50, %v502_v49  ;;  %v351_v52 = vpop.f32.mrb[5].mxu1 }
 0x1c5   :  { %v352_v53 = vadd.f32 %v502_v49, %v351_v52  ;;  %v552_v54 = vpop.f32.mrb[6].mxu1 }
 0x1c6   :  { %v363_v55 = vadd.f32 %v552_v54, %v502_v49  ;;  %v354_v56 = vpop.f32.mrb[7].mxu1  ;;  %v389_v57 = vsel %vm382_vm2, %v360_v51, -inf }
 0x1c7   :  { %v355_v58 = vadd.f32 %v502_v49, %v354_v56  ;;  %390 = vmax.xlane.f32.xlu1 %v389_v57  ;;  %v383_v59 = vsel %vm382_vm2, %v352_v53, -inf }
 0x1c8   :  { %384 = vmax.xlane.f32.xlu0 %v383_v59  ;;  %v392_v60 = vsel %vm382_vm2, %v363_v55, -inf }
 0x1c9   :  { %v386_v61 = vsel %vm382_vm2, %v355_v58, -inf }
 0x1cb   :  { %393 = vmax.xlane.f32.xlu1 %v392_v60 }
 0x1cc   :  { %387 = vmax.xlane.f32.xlu0 %v386_v61 }
 0x1cd   :  { %v555_v62 = vpop.f32.mrb[8].mxu1 }
 0x1ce   :  { %v367_v63 = vpop.f32.mrb[9].mxu1  ;;  %v376_v3 = vadd.f32 %v555_v62, %v502_v49 }
 0x1cf   :  { %v368_v0 = vadd.f32 %v502_v49, %v367_v63  ;;  %v556_v1 = vpop.f32.mrb[10].mxu1 }
 0x1d0   :  { %v370_v2 = vpop.f32.mrb[11].mxu1  ;;  %v379_v6 = vadd.f32 %v556_v1, %v502_v49  ;;  %v401_v8 = vsel %vm382_vm2, %v376_v3, -inf }
 0x1d1   :  { %v371_v4 = vadd.f32 %v502_v49, %v370_v2  ;;  %v395_v5 = vsel %vm382_vm2, %v368_v0, -inf }
 0x1d2   :  { %396 = vmax.xlane.f32.xlu0 %v395_v5  ;;  %v404_v9 = vsel %vm382_vm2, %v379_v6, -inf }
 0x1d3   :  { %v398_v7 = vsel %vm382_vm2, %v371_v4, -inf }
 0x1d4   :  { %399 = vmax.xlane.f32.xlu1 %v398_v7 }
 0x1d6   :  { %402 = vmax.xlane.f32.xlu0 %v401_v8 }
 0x1d8   :  { %405 = vmax.xlane.f32.xlu1 %v404_v9 }
 0x254   :  { %v391_v10 = vpop.xlane.xlu1 %390 }
 0x255   :  { %v409_v11 = vsub.f32 %v360_v51, %v391_v10  ;;  %v385_v12 = vpop.xlane.xlu0 %384 }
 0x256   :  { %v407_v13 = vsub.f32 %v352_v53, %v385_v12 }
 0x257   :  { %v419_v14 = vmul.f32 1.442695, %v409_v11 }
 0x258   :  { %v415_v15 = vmul.f32 1.442695, %v407_v13  ;;  %v394_v16 = vpop.xlane.xlu1 %393 }
 0x259   :  { %579 = vpow2.f32 %v419_v14  ;;  %v410_v17 = vsub.f32 %v363_v55, %v394_v16  ;;  %v388_v18 = vpop.xlane.xlu0 %387 }
 0x25a   :  { %v408_v19 = vsub.f32 %v355_v58, %v388_v18  ;;  %581 = vpow2.f32 %v415_v15 }
 0x25b   :  { %v421_v20 = vmul.f32 1.442695, %v410_v17 }
 0x25c   :  { %v417_v21 = vmul.f32 1.442695, %v408_v19 }
 0x25d   :  { %583 = vpow2.f32 %v421_v20 }
 0x25e   :  { %585 = vpow2.f32 %v417_v21 }
 0x25f   :  { %v397_v22 = vpop.xlane.xlu0 %396 }
 0x260   :  { %v411_v23 = vsub.f32 %v368_v0, %v397_v22 }
 0x261   :  { %v400_v24 = vpop.xlane.xlu1 %399 }
 0x262   :  { %v423_v25 = vmul.f32 1.442695, %v411_v23  ;;  %v412_v26 = vsub.f32 %v371_v4, %v400_v24 }
 0x263   :  { %v580_v27 = vpop.eup %579  ;;  %v403_v28 = vpop.xlane.xlu0 %402 }
 0x264   :  { %587 = vpow2.f32 %v423_v25  ;;  %v425_v29 = vmul.f32 1.442695, %v412_v26  ;;  %v413_v30 = vsub.f32 %v376_v3, %v403_v28  ;;  %v437_v31 = vsel %vm382_vm2, %v580_v27, 0.0  ;;  %v582_v32 = vpop.eup %581 }
 0x265   :  { %v406_v33 = vpop.xlane.xlu1 %405  ;;  %438 = vadd.xlane.f32.xlu0 %v437_v31  ;;  %v431_v39 = vsel %vm382_vm2, %v582_v32, 0.0 }
 0x266   :  { %589 = vpow2.f32 %v425_v29  ;;  %v427_v34 = vmul.f32 1.442695, %v413_v30  ;;  %v414_v35 = vsub.f32 %v379_v6, %v406_v33 }
 0x267   :  { %v584_v36 = vpop.eup %583 }
 0x268   :  { %591 = vpow2.f32 %v427_v34  ;;  %v429_v37 = vmul.f32 1.442695, %v414_v35  ;;  %v440_v38 = vsel %vm382_vm2, %v584_v36, 0.0  ;;  %v586_v40 = vpop.eup %585 }
 0x269   :  { %441 = vadd.xlane.f32.xlu1 %v440_v38  ;;  %432 = vadd.xlane.f32.xlu0 %v431_v39  ;;  %v434_v41 = vsel %vm382_vm2, %v586_v40, 0.0 }
 0x26a   :  { %593 = vpow2.f32 %v429_v37 }
 0x26d   :  { %435 = vadd.xlane.f32.xlu1 %v434_v41 }
 0x26e   :  { %v588_v42 = vpop.eup %587 }
 0x26f   :  { %v443_v43 = vsel %vm382_vm2, %v588_v42, 0.0 }
 0x270   :  { %v590_v44 = vpop.eup %589  ;;  %444 = vadd.xlane.f32.xlu0 %v443_v43 }
 0x271   :  { %v446_v45 = vsel %vm382_vm2, %v590_v44, 0.0 }
 0x272   :  { %v592_v46 = vpop.eup %591  ;;  %447 = vadd.xlane.f32.xlu1 %v446_v45 }
 0x273   :  { %v449_v47 = vsel %vm382_vm2, %v592_v46, 0.0 }
 0x274   :  { %v594_v48 = vpop.eup %593  ;;  %450 = vadd.xlane.f32.xlu0 %v449_v47 }
 0x275   :  { %v452_v49 = vsel %vm382_vm2, %v594_v48, 0.0 }
 0x276   :  { %453 = vadd.xlane.f32.xlu1 %v452_v49 }
 0x2f2   :  { %v439_v50 = vpop.xlane.xlu0 %438 }
 0x2f3   :  { %595 = vrcp.f32 %v439_v50 }
 0x2f6   :  { %v442_v51 = vpop.xlane.xlu1 %441  ;;  %v433_v52 = vpop.xlane.xlu0 %432 }
 0x2f7   :  { %597 = vrcp.f32 %v442_v51 }
 0x2f8   :  { %599 = vrcp.f32 %v433_v52 }
 0x2fa   :  { %v436_v53 = vpop.xlane.xlu1 %435 }
 0x2fb   :  { %601 = vrcp.f32 %v436_v53 }
 0x2fd   :  { %v596_v54 = vpop.eup %595  ;;  %v445_v55 = vpop.xlane.xlu0 %444 }
 0x2fe   :  { %v465_v56 = vmul.f32 %v596_v54, %v580_v27  ;;  %603 = vrcp.f32 %v445_v55 }
 0x2ff   :  { %v448_v57 = vpop.xlane.xlu1 %447 }
 0x300   :  { %473 = vst.msk [vmem:[%s760_s7 + $0x10] sm:$0xff] %vm382_vm2, %v465_v56  ;;  %605 = vrcp.f32 %v448_v57 }
 0x301   :  { %v598_v58 = vpop.eup %597  ;;  %v451_v59 = vpop.xlane.xlu0 %450 }
 0x302   :  { %v600_v60 = vpop.eup %599  ;;  %v466_v61 = vmul.f32 %v598_v58, %v584_v36  ;;  %607 = vrcp.f32 %v451_v59 }
 0x303   :  { %v463_v62 = vmul.f32 %v600_v60, %v582_v32  ;;  %v454_v63 = vpop.xlane.xlu1 %453 }
 0x304   :  { %474 = vst.msk [vmem:[%s760_s7 + $0x18] sm:$0xff] %vm382_vm2, %v466_v61  ;;  %609 = vrcp.f32 %v454_v63 }
 0x305   :  { %v602_v0 = vpop.eup %601  ;;  %471 = vst.msk [vmem:[%s760_s7] sm:$0xff] %vm382_vm2, %v463_v62 }
 0x306   :  { %v464_v1 = vmul.f32 %v602_v0, %v586_v40 }
 0x308   :  { %v604_v2 = vpop.eup %603  ;;  %472 = vst.msk [vmem:[%s760_s7 + $0x8] sm:$0xff] %vm382_vm2, %v464_v1 }
 0x309   :  { %v467_v3 = vmul.f32 %v604_v2, %v588_v42 }
 0x30a   :  { %v606_v4 = vpop.eup %605 }
 0x30b   :  { %475 = vst.msk [vmem:[%s760_s7 + $0x20] sm:$0xff] %vm382_vm2, %v467_v3  ;;  %v468_v5 = vmul.f32 %v606_v4, %v590_v44 }
 0x30c   :  { %v608_v6 = vpop.eup %607 }
 0x30d   :  { %476 = vst.msk [vmem:[%s760_s7 + $0x28] sm:$0xff] %vm382_vm2, %v468_v5  ;;  %v469_v7 = vmul.f32 %v608_v6, %v592_v46 }
 0x30e   :  { %v610_v8 = vpop.eup %609 }
 0x30f   :  { %477 = vst.msk [vmem:[%s760_s7 + $0x30] sm:$0xff] %vm382_vm2, %v469_v7  ;;  %v470_v9 = vmul.f32 %v610_v8, %v594_v48 }
 0x311   :  { %478 = vst.msk [vmem:[%s760_s7 + $0x38] sm:$0xff] %vm382_vm2, %v470_v9 }

</bundles_post_ra>
